<compile_context>
chip_gen: v7x
topology: tpu7x:2x2x1
jax: 0.10.0
libtpu: 0.0.40
codegen_flags: <defaults>
</compile_context>

<pallas_src>
import math
import functools

import jax
import jax.numpy as jnp
from jax.experimental import pallas as pl
from jax.experimental.pallas import tpu as pltpu

_VMEM_LIMIT = 32 * 1024 * 1024  # explicit scoped-VMEM budget, safe on v5e/v6e/v7x


def _round_up(n, m):
    return ((n + m - 1) // m) * m


def _pick_div(n, cap, step):
    """Largest tile <= cap that is a multiple of `step` and divides n.

    Returns n itself when n <= cap (full-extent block) or None when no
    suitable divisor exists (caller pads)."""
    if n <= cap:
        return n
    t = (cap // step) * step
    while t >= step:
        if n % t == 0:
            return t
        t -= step
    return None


# ----------------------------------------------------------------------------
# Tiled linear kernel: Y = X @ W + b (f32 accumulation, K-reduction grid axis).
# ----------------------------------------------------------------------------
def _linear_kernel(x_ref, w_ref, b_ref, o_ref, acc_ref):
    k = pl.program_id(2)

    @pl.when(k == 0)
    def _():
        acc_ref[...] = jnp.zeros_like(acc_ref)

    acc_ref[...] += jnp.dot(x_ref[...], w_ref[...],
                            preferred_element_type=jnp.float32)

    @pl.when(k == pl.num_programs(2) - 1)
    def _():
        # Bias kept in f32 and added to the f32 accumulator (intentional).
        o_ref[...] = (acc_ref[...] + b_ref[...]).astype(o_ref.dtype)


def _linear(x2d, w, b, *, out_dtype, tm_cap=256, tn_cap=512, tk_cap=512):
    """x2d: (M, K); w: (K, N); b: (1, N) f32. Returns (M, N) in out_dtype."""
    M, K = x2d.shape
    N = w.shape[1]

    tm = _pick_div(M, tm_cap, 8)
    if tm is None:  # no nice row divisor: zero-pad rows, slice result back
        Mp = _round_up(M, tm_cap)
        x2d = jnp.pad(x2d, ((0, Mp - M), (0, 0)))
        tm = tm_cap
    else:
        Mp = M
    # TODO(synk): pad N / K when they lack a 128-multiple divisor; the
    # full-extent fallback below is correct but un-tiled along that axis.
    tn = _pick_div(N, tn_cap, 128) or N
    tk = _pick_div(K, tk_cap, 128) or K

    out = pl.pallas_call(
        _linear_kernel,
        out_shape=jax.ShapeDtypeStruct((Mp, N), out_dtype),
        grid_spec=pltpu.PrefetchScalarGridSpec(
            num_scalar_prefetch=0,
            grid=(Mp // tm, N // tn, K // tk),
            in_specs=[
                pl.BlockSpec((tm, tk), lambda i, j, k: (i, k)),
                pl.BlockSpec((tk, tn), lambda i, j, k: (k, j)),
                pl.BlockSpec((1, tn), lambda i, j, k: (0, j)),
            ],
            out_specs=pl.BlockSpec((tm, tn), lambda i, j, k: (i, j)),
            scratch_shapes=[pltpu.VMEM((tm, tn), jnp.float32)],
        ),
        compiler_params=pltpu.CompilerParams(
            dimension_semantics=("parallel", "parallel", "arbitrary"),
            vmem_limit_bytes=_VMEM_LIMIT),
    )(x2d, w, b)
    return out[:M] if Mp != M else out


# ----------------------------------------------------------------------------
# Flash-style attention kernel (online softmax, f32 accumulators).
# Shared by the fused (head_dim % 128 == 0) and split (small head_dim) paths.
# ----------------------------------------------------------------------------
def _flash_attn_kernel(q_ref, k_ref, v_ref, o_ref, q_sc, m_sc, l_sc, acc_sc, *,
                       scale, kv_axis, kv_len, tk, need_mask, exp_dtype,
                       approx_recip):
    ki = pl.program_id(kv_axis)
    nk = pl.num_programs(kv_axis)

    @pl.when(ki == 0)
    def _():
        # Hoisted query scaling: q block is resident across the kv axis, so
        # scale it once per (b, h, q-tile) instead of every kv step.
        q_sc[...] = q_ref[0] * scale
        m_sc[...] = jnp.full(m_sc.shape, -jnp.inf, dtype=m_sc.dtype)
        l_sc[...] = jnp.zeros(l_sc.shape, dtype=l_sc.dtype)
        acc_sc[...] = jnp.zeros(acc_sc.shape, dtype=acc_sc.dtype)

    q = q_sc[...]                                   # (tq, hd), pre-scaled
    k = k_ref[0]                                    # (tk, hd)
    v = v_ref[0]                                    # (tk, hd)

    # Q . K^T without an explicit transpose: contract both last dims.
    s = jax.lax.dot_general(q, k, (((1,), (1,)), ((), ())),
                            preferred_element_type=jnp.float32)   # (tq, tk)

    if need_mask:  # only emitted when the seq length was padded
        col = ki * tk + jax.lax.broadcasted_iota(jnp.int32, s.shape, 1)
        s = jnp.where(col < kv_len, s, jnp.float32(-1e30))

    m_prev = m_sc[...]                                            # (tq, 1)
    m_new = jnp.maximum(m_prev, s.max(axis=-1, keepdims=True))
    alpha = jnp.exp(m_prev - m_new)                               # f32
    # exp in bf16 on v6e/v7x (compute_dtype=bf16) relieves the single EUP slot;
    # running max / denom / accumulator stay f32.
    p = jnp.exp((s - m_new).astype(exp_dtype))
    l_sc[...] = alpha * l_sc[...] + jnp.sum(p.astype(jnp.float32),
                                            axis=-1, keepdims=True)
    acc_sc[...] = alpha * acc_sc[...] + jnp.dot(
        p.astype(v.dtype), v, preferred_element_type=jnp.float32)
    m_sc[...] = m_new

    @pl.when(ki == nk - 1)
    def _():
        if approx_recip:
            inv_l = pl.reciprocal(l_sc[...], approx=True)         # EUP slot
            o_ref[0] = (acc_sc[...] * inv_l).astype(o_ref.dtype)
        else:
            o_ref[0] = (acc_sc[...] / l_sc[...]).astype(o_ref.dtype)


def _flash_scratch(tq, hd, compute_dtype):
    return [
        pltpu.VMEM((tq, hd), compute_dtype),   # scaled q (hoisted)
        pltpu.VMEM((tq, 1), jnp.float32),      # running max
        pltpu.VMEM((tq, 1), jnp.float32),      # running denom
        pltpu.VMEM((tq, hd), jnp.float32),     # output accumulator
    ]


def _flash_tiles(S, q_cap=512, kv_cap=512):
    tq = _pick_div(S, q_cap, 8)
    tk = _pick_div(S, kv_cap, 8)
    if tq is None or tk is None:
        tq = tk = 256
        return tq, tk, _round_up(S, 256)
    return tq, tk, S


def _exp_dtype(compute_dtype):
    # bf16 exp only when the compute dtype is bf16 (v6e/v7x); keep f32 on v5e.
    return jnp.bfloat16 if jnp.dtype(compute_dtype) == jnp.bfloat16 else jnp.float32


def _flash_attention_fused(qkv, *, B, S, num_heads, head_dim, scale, out_dtype,
                           compute_dtype, approx_recip):
    """Fused path (head_dim % 128 == 0): reads (B, S, 3E) qkv directly and
    writes (B, S, E) — head split/merge folded into the BlockSpecs."""
    H, hd = num_heads, head_dim
    E = H * hd
    tq, tk, S_pad = _flash_tiles(S)
    if S_pad != S:
        qkv = jnp.pad(qkv, ((0, 0), (0, S_pad - S), (0, 0)))
    need_mask = S_pad != S

    kernel = functools.partial(
        _flash_attn_kernel, scale=scale, kv_axis=3, kv_len=S, tk=tk,
        need_mask=need_mask, exp_dtype=_exp_dtype(compute_dtype),
        approx_recip=approx_recip)

    out = pl.pallas_call(
        kernel,
        out_shape=jax.ShapeDtypeStruct((B, S_pad, E), out_dtype),
        grid_spec=pltpu.PrefetchScalarGridSpec(
            num_scalar_prefetch=0,
            grid=(B, H, S_pad // tq, S_pad // tk),
            in_specs=[
                # Per-head column layout of qkv is [q | k | v], so block
                # (of width hd) indices along the last dim are 3h, 3h+1, 3h+2.
                pl.BlockSpec((1, tq, hd), lambda b, h, qi, ki: (b, qi, 3 * h)),
                pl.BlockSpec((1, tk, hd), lambda b, h, qi, ki: (b, ki, 3 * h + 1)),
                pl.BlockSpec((1, tk, hd), lambda b, h, qi, ki: (b, ki, 3 * h + 2)),
            ],
            out_specs=pl.BlockSpec((1, tq, hd), lambda b, h, qi, ki: (b, qi, h)),
            scratch_shapes=_flash_scratch(tq, hd, compute_dtype),
        ),
        compiler_params=pltpu.CompilerParams(
            dimension_semantics=("parallel", "parallel", "parallel", "arbitrary"),
            vmem_limit_bytes=_VMEM_LIMIT),
    )(qkv, qkv, qkv)
    return out[:, :S, :] if need_mask else out


def _flash_attention_split(q, k, v, *, scale, out_dtype, compute_dtype,
                           approx_recip):
    """Fallback path: q, k, v already split to (B*H, S, hd)."""
    BH, S, hd = q.shape
    tq, tk, S_pad = _flash_tiles(S)
    if S_pad != S:
        pad = ((0, 0), (0, S_pad - S), (0, 0))
        q, k, v = jnp.pad(q, pad), jnp.pad(k, pad), jnp.pad(v, pad)
    need_mask = S_pad != S

    kernel = functools.partial(
        _flash_attn_kernel, scale=scale, kv_axis=2, kv_len=S, tk=tk,
        need_mask=need_mask, exp_dtype=_exp_dtype(compute_dtype),
        approx_recip=approx_recip)

    out = pl.pallas_call(
        kernel,
        out_shape=jax.ShapeDtypeStruct((BH, S_pad, hd), out_dtype),
        grid_spec=pltpu.PrefetchScalarGridSpec(
            num_scalar_prefetch=0,
            grid=(BH, S_pad // tq, S_pad // tk),
            in_specs=[
                pl.BlockSpec((1, tq, hd), lambda b, qi, ki: (b, qi, 0)),
                pl.BlockSpec((1, tk, hd), lambda b, qi, ki: (b, ki, 0)),
                pl.BlockSpec((1, tk, hd), lambda b, qi, ki: (b, ki, 0)),
            ],
            out_specs=pl.BlockSpec((1, tq, hd), lambda b, qi, ki: (b, qi, 0)),
            scratch_shapes=_flash_scratch(tq, hd, compute_dtype),
        ),
        compiler_params=pltpu.CompilerParams(
            dimension_semantics=("parallel", "parallel", "arbitrary"),
            vmem_limit_bytes=_VMEM_LIMIT),
    )(q, k, v)
    return out[:, :S, :] if need_mask else out


# ----------------------------------------------------------------------------
# Full MultiheadAttention forward.
# ----------------------------------------------------------------------------
def multihead_attention(x, w_qkv_t, b_qkv, w_o_t, b_o, *, num_heads,
                        compute_dtype=jnp.float32, approx_recip=True):
    """x: (B, S, D_in); w_qkv_t: (D_in, 3E); w_o_t: (E, E); biases (1, .) f32.

    compute_dtype controls MXU operand dtype (bf16 recommended on v6e/v7x);
    accumulation and softmax statistics stay f32.
    NOTE: the qkv column convention (per head [q|k|v]) matches the JTAE module,
    NOT stock torch.nn.MultiheadAttention's stacked [Q;K;V] in_proj_weight.
    """
    B, S, D_in = x.shape
    E3 = w_qkv_t.shape[1]
    E = E3 // 3
    hd = E // num_heads
    out_dtype = x.dtype
    cd = compute_dtype
    scale = 1.0 / math.sqrt(hd)

    # 1) QKV projection (tiled Pallas matmul, f32 accumulation).
    qkv = _linear(x.reshape(B * S, D_in).astype(cd), w_qkv_t.astype(cd), b_qkv,
                  out_dtype=cd)                                      # (B*S, 3E)

    if hd % 128 == 0:
        # 2+3) Fused: head split/merge folded into the flash BlockSpecs.
        vals = _flash_attention_fused(
            qkv.reshape(B, S, E3), B=B, S=S, num_heads=num_heads, head_dim=hd,
            scale=scale, out_dtype=cd, compute_dtype=cd,
            approx_recip=approx_recip)                               # (B, S, E)
        vals2d = vals.reshape(B * S, E)
    else:
        # Small head_dim: one fused transpose each way (was ~6 separate ops).
        qkv5 = qkv.reshape(B, S, num_heads, 3, hd)
        qkv_t = jnp.transpose(qkv5, (3, 0, 2, 1, 4))       # (3, B, H, S, hd)
        q = qkv_t[0].reshape(B * num_heads, S, hd)
        k = qkv_t[1].reshape(B * num_heads, S, hd)
        v = qkv_t[2].reshape(B * num_heads, S, hd)
        vals = _flash_attention_split(q, k, v, scale=scale, out_dtype=cd,
                                      compute_dtype=cd,
                                      approx_recip=approx_recip)     # (BH, S, hd)
        vals2d = (vals.reshape(B, num_heads, S, hd)
                      .transpose(0, 2, 1, 3)
                      .reshape(B * S, E))

    # 4) Output projection.
    o = _linear(vals2d, w_o_t.astype(cd), b_o, out_dtype=out_dtype)
    return o.reshape(B, S, E)


# ----------------------------------------------------------------------------
# Validation helpers.
# ----------------------------------------------------------------------------
def _xavier_uniform(key, fan_out, fan_in, dtype=jnp.float32):
    bound = math.sqrt(6.0 / (fan_in + fan_out))
    return jax.random.uniform(key, (fan_out, fan_in), dtype,
                              minval=-bound, maxval=bound)


def _reference(x, w_qkv_t, b_qkv, w_o_t, b_o, num_heads):
    """Plain-JAX mirror of the PyTorch forward for validation."""
    B, S, D_in = x.shape
    E = w_o_t.shape[0]
    hd = E // num_heads
    qkv = x @ w_qkv_t + b_qkv[0]                             # (B, S, 3E)
    qkv = qkv.reshape(B, S, num_heads, 3 * hd).transpose(0, 2, 1, 3)
    q, k, v = jnp.split(qkv, 3, axis=-1)                     # (B, H, S, hd)
    logits = jnp.einsum("bhqd,bhkd->bhqk", q, k) / math.sqrt(hd)
    attn = jax.nn.softmax(logits, axis=-1)
    vals = jnp.einsum("bhqk,bhkd->bhqd", attn, v)
    vals = vals.transpose(0, 2, 1, 3).reshape(B, S, E)
    return vals @ w_o_t + b_o[0]


def _run_case(key, *, B, S, D_in, E, H, cd, approx, atol, rtol, tag):
    kx, kq, ko = jax.random.split(key, 3)
    x = jax.random.normal(kx, (B, S, D_in), dtype=jnp.float32)
    # xavier_uniform weights / zero biases, matching _reset_parameters.
    w_qkv = _xavier_uniform(kq, 3 * E, D_in)                 # (3E, D_in)
    w_o = _xavier_uniform(ko, E, E)                          # (E, E)
    b_qkv = jnp.zeros((1, 3 * E), jnp.float32)
    b_o = jnp.zeros((1, E), jnp.float32)
    w_qkv_t, w_o_t = w_qkv.T, w_o.T                          # x @ W convention

    ref = _reference(x, w_qkv_t, b_qkv, w_o_t, b_o, H)
    out = multihead_attention(x, w_qkv_t, b_qkv, w_o_t, b_o, num_heads=H,
                              compute_dtype=cd, approx_recip=approx)
    out = jax.block_until_ready(out)
    assert out.shape == (B, S, E), (tag, out.shape)
    out_f32 = out.astype(jnp.float32)
    err = float(jnp.max(jnp.abs(out_f32 - ref)))
    assert jnp.allclose(out_f32, ref, atol=atol, rtol=rtol), (tag, err)


if __name__ == "__main__":
    key = jax.random.PRNGKey(0)
    k1, k2, k3 = jax.random.split(key, 3)

    # Toy config implied by the module (head_dim=8 -> split/merge fallback).
    _run_case(k1, B=2, S=8, D_in=32, E=32, H=4,
              cd=jnp.float32, approx=False, atol=5e-3, rtol=5e-3, tag="toy_f32")
    _run_case(k2, B=2, S=8, D_in=32, E=32, H=4,
              cd=jnp.bfloat16, approx=True, atol=4e-2, rtol=4e-2, tag="toy_bf16")
    # head_dim=128 -> fully fused BlockSpec path (no wrapper transposes,
    # lane-dense output stores), bf16 MXU operands with f32 accumulation.
    _run_case(k3, B=2, S=256, D_in=64, E=256, H=2,
              cd=jnp.bfloat16, approx=True, atol=4e-2, rtol=4e-2, tag="fused_bf16")

    print("KERNEL_OK")
</pallas_src>

<mosaic_0001>
module attributes {stable_mosaic.version = 11 : i64} {
  func.func @_linear_kernel(%arg0: i32, %arg1: i32, %arg2: i32, %arg3: memref<16x32xf32, #tpu.memory_space<vmem>>, %arg4: memref<32x96xf32, #tpu.memory_space<vmem>>, %arg5: memref<1x96xf32, #tpu.memory_space<vmem>>, %arg6: memref<16x96xf32, #tpu.memory_space<vmem>>, %arg7: memref<16x96xf32, #tpu.memory_space<vmem>>) attributes {dimension_semantics = [#tpu.dimension_semantics<parallel>, #tpu.dimension_semantics<parallel>, #tpu.dimension_semantics<arbitrary>], iteration_bounds = array<i64: 1, 1, 1>, scalar_prefetch = 0 : i64, scratch_operands = 1 : i64, tpu.core_type = #tpu.core_type<tc>, window_params = [{transform_indices = @transform_0, window_bounds = array<i64: 16, 32>}, {transform_indices = @transform_1, window_bounds = array<i64: 32, 96>}, {transform_indices = @transform_2, window_bounds = array<i64: 1, 96>}, {transform_indices = @transform_3, window_bounds = array<i64: 16, 96>}]} {
    %c0_i32 = arith.constant 0 : i32
    %0 = arith.cmpi eq, %arg2, %c0_i32 : i32
    %1 = arith.extui %0 : i1 to i32
    %c0_i32_0 = arith.constant 0 : i32
    %2 = arith.cmpi ne, %1, %c0_i32_0 : i32
    scf.if %2 {
      %cst_10 = arith.constant 0.000000e+00 : f32
      %12 = vector.broadcast %cst_10 : f32 to vector<16x96xf32>
      %c0_11 = arith.constant 0 : index
      %c0_12 = arith.constant 0 : index
      %13 = vector.load %arg7[%c0_11, %c0_12] : memref<16x96xf32, #tpu.memory_space<vmem>>, vector<16x96xf32>
      tpu.vector_store %arg7[%c0_11, %c0_12], %12 {strides = array<i32>} : memref<16x96xf32, #tpu.memory_space<vmem>>, vector<16x96xf32>,
    } else {
    }
    %c0 = arith.constant 0 : index
    %c0_1 = arith.constant 0 : index
    %3 = vector.load %arg7[%c0, %c0_1] : memref<16x96xf32, #tpu.memory_space<vmem>>, vector<16x96xf32>
    %c0_2 = arith.constant 0 : index
    %c0_3 = arith.constant 0 : index
    %4 = vector.load %arg3[%c0_2, %c0_3] : memref<16x32xf32, #tpu.memory_space<vmem>>, vector<16x32xf32>
    %c0_4 = arith.constant 0 : index
    %c0_5 = arith.constant 0 : index
    %5 = vector.load %arg4[%c0_4, %c0_5] : memref<32x96xf32, #tpu.memory_space<vmem>>, vector<32x96xf32>
    %cst = arith.constant dense<0.000000e+00> : vector<16x96xf32>
    %6 = tpu.matmul %4, %5, %cst {dimension_numbers = #tpu.dot_dimension_numbers<[1], [0], [0], [1], [0, 0, 1, 1], [], []>} : vector<16x32xf32>, vector<32x96xf32>, vector<16x96xf32> -> vector<16x96xf32>
    %7 = arith.addf %3, %6 : vector<16x96xf32>
    %c0_6 = arith.constant 0 : index
    %c0_7 = arith.constant 0 : index
    %8 = vector.load %arg7[%c0_6, %c0_7] : memref<16x96xf32, #tpu.memory_space<vmem>>, vector<16x96xf32>
    tpu.vector_store %arg7[%c0_6, %c0_7], %7 {strides = array<i32>} : memref<16x96xf32, #tpu.memory_space<vmem>>, vector<16x96xf32>,
    %c0_i32_8 = arith.constant 0 : i32
    %9 = arith.cmpi eq, %arg2, %c0_i32_8 : i32
    %10 = arith.extui %9 : i1 to i32
    %c0_i32_9 = arith.constant 0 : i32
    %11 = arith.cmpi ne, %10, %c0_i32_9 : i32
    scf.if %11 {
      %c0_10 = arith.constant 0 : index
      %c0_11 = arith.constant 0 : index
      %12 = vector.load %arg7[%c0_10, %c0_11] : memref<16x96xf32, #tpu.memory_space<vmem>>, vector<16x96xf32>
      %c0_12 = arith.constant 0 : index
      %c0_13 = arith.constant 0 : index
      %13 = vector.load %arg5[%c0_12, %c0_13] : memref<1x96xf32, #tpu.memory_space<vmem>>, vector<1x96xf32>
      %14 = vector.broadcast %13 : vector<1x96xf32> to vector<16x96xf32>
      %15 = arith.addf %12, %14 : vector<16x96xf32>
      %c0_14 = arith.constant 0 : index
      %c0_15 = arith.constant 0 : index
      %16 = vector.load %arg6[%c0_14, %c0_15] : memref<16x96xf32, #tpu.memory_space<vmem>>, vector<16x96xf32>
      tpu.vector_store %arg6[%c0_14, %c0_15], %15 {strides = array<i32>} : memref<16x96xf32, #tpu.memory_space<vmem>>, vector<16x96xf32>,
    } else {
    }
    return
  }
  func.func @transform_0(%arg0: i32, %arg1: i32, %arg2: i32) -> (i32, i32) {
    %c0_i32 = arith.constant 0 : i32
    return %arg0, %arg2 : i32, i32
  }
  func.func @transform_1(%arg0: i32, %arg1: i32, %arg2: i32) -> (i32, i32) {
    %c0_i32 = arith.constant 0 : i32
    return %arg2, %arg1 : i32, i32
  }
  func.func @transform_2(%arg0: i32, %arg1: i32, %arg2: i32) -> (i32, i32) {
    %c0_i32 = arith.constant 0 : i32
    %c0_i32_0 = arith.constant 0 : i32
    return %c0_i32, %arg1 : i32, i32
  }
  func.func @transform_3(%arg0: i32, %arg1: i32, %arg2: i32) -> (i32, i32) {
    %c0_i32 = arith.constant 0 : i32
    return %arg0, %arg1 : i32, i32
  }
}

</mosaic_0001>

<bundles_post_ra>
// kernel: tpu_custom_call.1
= control target key start
LH: loop header
LB: loop body
LE: loop exit
PB: predicated region body
PF: predicated region fallthrough
CT: control target
= control target key end

     0   :  { %8 = vsyncpa [#allocation4], 0  ;;  %s365_s0 = inlined_call_operand.hbm [shape: f32[16,32], index: 0, kind: input, shape index: {}]   ;;  %s366_s1 = inlined_call_operand.hbm [shape: f32[32,96], index: 1, kind: input, shape index: {}]   ;;  %s367_s2 = inlined_call_operand.vmem [shape: f32[1,96], index: 2, kind: input, shape index: {}]   ;;  %s368_s3 = inlined_call_operand.hbm [shape: f32[16,96], index: 3, kind: output, shape index: {}]  }
   0x1   :  { %9 = vsyncpa [#allocation7], 0 }
   0x2   :  { %10 = vsyncpa [#allocation5], 0  ;;  %s285_s12 = smov [#allocation3]   ;;  %s213_s16 = scalar_lea.hbm %s365_s0, 256 }
   0x3   :  { %s16_s13 = sshll.u32 %s285_s12, 4  ;;  %p214_p0 = scmp.ne.s32.totalorder %s365_s0, %s213_s16  ;;  %s17_s13 = int_to_ptr.vmem [resolvable:$true] %s16_s13 }
   0x4   :  { %p217_p1 = scmp.lt.u32.totalorder %s213_s16, %s365_s0 }
   0x6   :  { %p219_p2 = pnand %p217_p1, %p214_p0 }
   0x8   :  { %222 = shalt.err (!%p219_p2)
}
   0x9   :  { %s223_s21 = scalar_lea.vmem %s17_s13, 256  ;;  %p228_p4 = scmp.lt.s32.totalorder %s17_s13, %s17_s13 }
   0xa   :  { %p224_p3 = scmp.ne.s32.totalorder %s17_s13, %s223_s21  ;;  %p229_p5 = scmp.lt.s32.totalorder %s223_s21, %s223_s21 }
   0xc   :  { %p230_p6 = por %p229_p5, %p228_p4 }
   0xe   :  { %p231_p7 = pnand %p230_p6, %p224_p3 }
  0x10   :  { %234 = shalt.err (!%p231_p7)
}
  0x11   :  { %s286_s22 = smov 128   ;;  %s287_s23 = smov 8  }
  0x12   :  { %22 = dma.hbm_to_vmem [thread:$0]  %s365_s0, 256, %s17_s13, [#allocation4], %s286_s22, %s286_s22, %s287_s23  }
  0x13   :  { %s288_s26 = smov [#allocation6]   ;;  %s235_s30 = scalar_lea.hbm %s366_s1, 512 }
  0x14   :  { %s28_s27 = sshll.u32 %s288_s26, 4  ;;  %p236_p8 = scmp.ne.s32.totalorder %s366_s1, %s235_s30  ;;  %s29_s27 = int_to_ptr.vmem [resolvable:$true] %s28_s27 }
  0x15   :  { %p239_p9 = scmp.lt.u32.totalorder %s235_s30, %s366_s1 }
  0x17   :  { %p241_p10 = pnand %p239_p9, %p236_p8 }
  0x19   :  { %244 = shalt.err (!%p241_p10)
}
  0x1a   :  { %s245_s8 = scalar_lea.vmem %s29_s27, 512  ;;  %p250_p12 = scmp.lt.s32.totalorder %s29_s27, %s29_s27 }
  0x1b   :  { %p246_p11 = scmp.ne.s32.totalorder %s29_s27, %s245_s8  ;;  %p251_p13 = scmp.lt.s32.totalorder %s245_s8, %s245_s8 }
  0x1d   :  { %p252_p0 = por %p251_p13, %p250_p12 }
  0x1f   :  { %p253_p1 = pnand %p252_p0, %p246_p11 }
  0x21   :  { %256 = shalt.err (!%p253_p1)
}
  0x22   :  { %34 = dma.hbm_to_vmem [thread:$0]  %s366_s1, 512, %s29_s27, [#allocation7], %s286_s22, %s286_s22, %s287_s23  }
  0x23   :  { %279 = dma.done.wait [#allocation4], 256  }
  0x24   :  { %280 = vsyncadd [#allocation4], 4294967040 }
  0x25   :  { %281 = dma.done.wait [#allocation7], 512  }
  0x26   :  { %282 = vsyncadd [#allocation7], 4294966784  ;;  %vm47_vm0 = vcmask 785408   ;;  %v289_v0 = vmov 0.0   ;;  %vm58_vm1 = vcmask 261120   ;;  %v54_v1 = vld [vmem:[#allocation6] sm:$0xff] }
  0x27   :  { %49 = vst.msk [vmem:[#allocation2 + $0x8] sm:$0xff] %vm47_vm0, %v289_v0  ;;  %48 = vst.msk [vmem:[#allocation2] sm:$0xff] %vm47_vm0, %v289_v0  ;;  %v55_v2 = vld [vmem:[#allocation6 + $0x8] sm:$0xff]  ;;  %v56_v3 = vld [vmem:[#allocation6 + $0x10] sm:$0xff]  ;;  %s290_s11 = smov [#allocation8]  }
  0x28   :  { %v199_v4 = vpack.c.bf16 %v55_v2, %v54_v1  ;;  %v57_v5 = vld [vmem:[#allocation6 + $0x18] sm:$0xff]  ;;  %v52_v6 = vld [vmem:[#allocation3] sm:$0xff]  ;;  %v181_v15 = vld [vmem:[%s367_s2] ss:$0 sm:$0xff]  ;;  %s166_s12 = sshll.u32 %s290_s11, 4  ;;  %s167_s12 = int_to_ptr.vmem [resolvable:$true] %s166_s12 }
  0x29   :  { %v203_v7 = vpack.c.bf16 %v57_v5, %v56_v3  ;;  %196 = vmatprep.mubr.msk.f32.mxu0 %vm58_vm1, %v52_v6  ;;  %v53_v8 = vld [vmem:[#allocation3 + $0x8] sm:$0xff]  ;;  %s257_s13 = scalar_lea.vmem %s167_s12, 256  ;;  %p262_p3 = scmp.lt.s32.totalorder %s167_s12, %s167_s12 }
  0x2a   :  { %200 = vmatprep.subr.bf16.mxu0 %v199_v4  ;;  %p258_p2 = scmp.ne.s32.totalorder %s167_s12, %s257_s13  ;;  %p263_p4 = scmp.lt.s32.totalorder %s257_s13, %s257_s13 }
  0x2b   :  { %202 = vmatpush3.bf16.msra.mxu0 %v199_v4 }
  0x2c   :  { %204 = vmatprep.subr.bf16.mxu0 %v203_v7  ;;  %p264_p5 = por %p263_p4, %p262_p3 }
  0x2e   :  { %v51_v9 = vld [vmem:[#allocation2 + $0x8] sm:$0xff]  ;;  %v50_v10 = vld [vmem:[#allocation2] sm:$0xff]  ;;  %p265_p6 = pnand %p264_p5, %p258_p2 }
  0x2f   :  { %206 = vmatpush3.bf16.msra.mxu0 %v203_v7 }
  0x32   :  { %197 = vmatmul.mubr.msk.f32.vlgmr.msra.gmra.mrb[0].mxu0 %vm58_vm1, %v53_v8 }
 0x105   :  { %v198_v11 = vpop.f32.mrb[0].mxu0 }
 0x106   :  { %v141_v12 = vadd.f32 %v198_v11, %v51_v9  ;;  %v131_v13 = vpop.f32.mrb[1].mxu0 }
 0x107   :  { %v140_v14 = vadd.f32 %v131_v13, %v50_v10 }
 0x108   :  { %144 = vst.msk [vmem:[#allocation2 + $0x8] sm:$0xff] %vm47_vm0, %v141_v12 }
 0x109   :  { %143 = vst.msk [vmem:[#allocation2] sm:$0xff] %vm47_vm0, %v140_v14 }
 0x10f   :  { %v149_v16 = vld [vmem:[#allocation2 + $0x8] sm:$0xff] }
 0x110   :  { %v148_v17 = vld [vmem:[#allocation2] sm:$0xff]  ;;  %v158_v18 = vadd.f32 %v181_v15, %v149_v16 }
 0x111   :  { %v157_v19 = vadd.f32 %v181_v15, %v148_v17 }
 0x112   :  { %160 = vst.msk [vmem:[#allocation8 + $0x8] sm:$0xff] %vm47_vm0, %v158_v18 }
 0x113   :  { %159 = vst.msk [vmem:[#allocation8] sm:$0xff] %vm47_vm0, %v157_v19 }
 0x114   :  { %268 = shalt.err (!%p265_p6)
}
 0x115   :  { %s269_s15 = scalar_lea.hbm %s368_s3, 256 }
 0x116   :  { %p270_p7 = scmp.ne.s32.totalorder %s368_s3, %s269_s15  ;;  %p273_p8 = scmp.lt.u32.totalorder %s269_s15, %s368_s3 }
 0x118   :  { %p275_p9 = pnand %p273_p8, %p270_p7 }
 0x11a   :  { %278 = shalt.err (!%p275_p9)
}
 0x11b   :  { %172 = dma.vmem_to_hbm [thread:$0]  %s167_s12, 256, %s368_s3, [#allocation5], %s286_s22, %s286_s22, %s287_s23  }
 0x11c   :  { %283 = dma.done.wait [#allocation5], 256  }
 0x11d   :  { %284 = vsyncadd [#allocation5], 4294967040 }
 0x11e   :  { %176 = vsyncpa [#allocation4], 1 }
 0x11f   :  { %177 = vsyncpa [#allocation7], 1 }
 0x120   :  { %178 = vsyncpa [#allocation5], 1 }

</bundles_post_ra>
